<compile_context>
chip_gen: v6e
topology: v6e:2x2x1
jax: 0.10.0
libtpu: 0.0.40
codegen_flags: <defaults>
</compile_context>

<pallas_src>
import functools

import jax
import jax.numpy as jnp
from jax import lax
from jax.experimental import pallas as pl
from jax.experimental.pallas import tpu as pltpu

# problem sizes (small, consistent with torch.nn.Linear(20, 20))
B = 4      # batch (all processed in a single grid step below)
SQ = 8     # query sequence length
SK = 8     # key / value sequence length
D = 20     # model dim (Linear(20, 20))
DV = 16    # value feature dim
SCALE = 1.0 / (D ** 0.5)   # scale_factor `f`
DROPOUT_P = 0.0            # dropout_p `p`
# TODO(synk): nonzero dropout would need pltpu.prng_seed/prng_random_bits inside
# this kernel; with p=0.0 F.dropout is the identity, which is what we reproduce.


def attention_kernel(xqk_ref, wqk_ref, bqk_ref, v_ref, o_ref, *,
                     scale, bt, sq, sk, d):
    """Fused (q,k) projection + scaled-dot-product attention for `bt` batches.

    xqk_ref : (bt*(sq+sk), d)  rows grouped per batch as [x1 rows ; x2 rows]
    wqk_ref : (d, 2*d)         packed [Wq^T | Wk^T]
    bqk_ref : (1, 2*d)         packed [bq | bk]
    v_ref   : (bt, sk, dv)
    o_ref   : (bt, sq, dv)
    """
    s12 = sq + sk

    # Single tall projection matmul: one MXU RHS push / result pop produces
    # both q and k for every batch in this tile.
    proj = jnp.dot(xqk_ref[...], wqk_ref[...],
                   preferred_element_type=jnp.float32) + bqk_ref[...]
    proj = proj.reshape(bt, s12, 2 * d)

    q = proj[:, :sq, :d]        # (bt, sq, d)   x1 rows @ Wq^T + bq
    k = proj[:, sq:, d:]        # (bt, sk, d)   x2 rows @ Wk^T + bk

    # Batched qk = q @ k^T without materializing a transpose of k.
    qk = lax.dot_general(
        q, k,
        dimension_numbers=(((2,), (2,)), ((0,), (0,))),
        preferred_element_type=jnp.float32) * scale        # (bt, sq, sk)

    # numerically-stable softmax along last dim
    m = jnp.max(qk, axis=-1, keepdims=True)
    e = jnp.exp(qk - m)
    s = jnp.sum(e, axis=-1, keepdims=True)
    p = e * pl.reciprocal(s, approx=False)   # approx=False keeps 1e-4 tolerance

    # dropout with p == 0.0 is the identity

    out = lax.dot_general(
        p, v_ref[...],
        dimension_numbers=(((2,), (1,)), ((0,), (0,))),
        preferred_element_type=jnp.float32)                 # (bt, sq, dv)
    o_ref[...] = out.astype(o_ref.dtype)


def attention_forward(x1, x2, wq_t, bq, wk_t, bk, v,
                      scale=SCALE, batch_tile=None):
    b, sq, d = x1.shape
    _, sk, _ = x2.shape
    dv = v.shape[-1]
    s12 = sq + sk

    # By default the whole batch runs in one grid step (per-step overhead
    # dominates at these sizes).  For large B, pass batch_tile < B; the batch
    # grid axis stays "parallel" so megacore parts (v7x) shard it across TCs.
    bt = b if batch_tile is None else batch_tile
    assert b % bt == 0, "batch must be divisible by batch_tile"
    nb = b // bt

    # Pack inputs/params so the two Linear layers become one tall matmul:
    #   xqk : (B*(SQ+SK), D)  per-batch row groups [x1 rows ; x2 rows]
    #   wqk : (D, 2D) = [Wq^T | Wk^T],  bqk : (1, 2D) = [bq | bk]
    xqk = jnp.concatenate([x1, x2], axis=1).reshape(b * s12, d)
    wqk = jnp.concatenate([wq_t, wk_t], axis=1)
    bqk = jnp.concatenate([bq, bk]).reshape(1, 2 * d)

    kernel = functools.partial(attention_kernel, scale=scale,
                               bt=bt, sq=sq, sk=sk, d=d)

    return pl.pallas_call(
        kernel,
        out_shape=jax.ShapeDtypeStruct((b, sq, dv), jnp.float32),
        grid_spec=pltpu.PrefetchScalarGridSpec(
            num_scalar_prefetch=0,
            grid=(nb,),
            in_specs=[
                pl.BlockSpec((bt * s12, d), lambda i: (i, 0)),    # packed x1/x2
                pl.BlockSpec((d, 2 * d), lambda i: (0, 0)),       # [Wq^T | Wk^T]
                pl.BlockSpec((1, 2 * d), lambda i: (0, 0)),       # [bq | bk]
                pl.BlockSpec((bt, sk, dv), lambda i: (i, 0, 0)),  # v
            ],
            out_specs=pl.BlockSpec((bt, sq, dv), lambda i: (i, 0, 0)),
        ),
        compiler_params=pltpu.CompilerParams(
            dimension_semantics=("parallel",)),
    )(xqk, wqk, bqk, v)


def reference_forward(x1, x2, wq_t, bq, wk_t, bk, v, scale=SCALE):
    q = jnp.einsum("bsd,de->bse", x1, wq_t) + bq
    k = jnp.einsum("bsd,de->bse", x2, wk_t) + bk
    qk = jnp.einsum("bqd,bkd->bqk", q, k) * scale
    p = jax.nn.softmax(qk, axis=-1)
    return jnp.einsum("bqk,bkv->bqv", p, v)


if __name__ == "__main__":
    key = jax.random.PRNGKey(0)
    k1, k2, k3, k4, k5, k6, k7 = jax.random.split(key, 7)

    # inputs
    x1 = jax.random.normal(k1, (B, SQ, D), dtype=jnp.float32)
    x2 = jax.random.normal(k2, (B, SK, D), dtype=jnp.float32)
    v = jax.random.normal(k3, (B, SK, DV), dtype=jnp.float32)

    # deterministic parameter init (uniform in [-1/sqrt(D), 1/sqrt(D)],
    # like torch.nn.Linear's default). Stored transposed: (in, out).
    bound = 1.0 / (D ** 0.5)
    wq_t = jax.random.uniform(k4, (D, D), minval=-bound, maxval=bound,
                              dtype=jnp.float32)
    bq = jax.random.uniform(k5, (D,), minval=-bound, maxval=bound,
                            dtype=jnp.float32)
    wk_t = jax.random.uniform(k6, (D, D), minval=-bound, maxval=bound,
                              dtype=jnp.float32)
    bk = jax.random.uniform(k7, (D,), minval=-bound, maxval=bound,
                            dtype=jnp.float32)

    out = attention_forward(x1, x2, wq_t, bq, wk_t, bk, v)
    out = jax.block_until_ready(out)

    ref = reference_forward(x1, x2, wq_t, bq, wk_t, bk, v)
    assert out.shape == (B, SQ, DV)
    assert jnp.allclose(out, ref, atol=1e-4, rtol=1e-4), "mismatch vs reference"

    print("KERNEL_OK")
</pallas_src>

<mosaic_0001>
module attributes {stable_mosaic.version = 11 : i64} {
  func.func @attention_kernel(%arg0: i32, %arg1: memref<64x20xf32, #tpu.memory_space<vmem>>, %arg2: memref<20x40xf32, #tpu.memory_space<vmem>>, %arg3: memref<1x40xf32, #tpu.memory_space<vmem>>, %arg4: memref<4x8x16xf32, #tpu.memory_space<vmem>>, %arg5: memref<4x8x16xf32, #tpu.memory_space<vmem>>) attributes {dimension_semantics = [#tpu.dimension_semantics<parallel>], iteration_bounds = array<i64: 1>, scalar_prefetch = 0 : i64, scratch_operands = 0 : i64, tpu.core_type = #tpu.core_type<tc>, window_params = [{transform_indices = @transform_0, window_bounds = array<i64: 64, 20>}, {pipeline_mode = #tpu.pipeline_mode<synchronous>, transform_indices = @transform_1, window_bounds = array<i64: 20, 40>}, {pipeline_mode = #tpu.pipeline_mode<synchronous>, transform_indices = @transform_2, window_bounds = array<i64: 1, 40>}, {transform_indices = @transform_3, window_bounds = array<i64: 4, 8, 16>}, {transform_indices = @transform_4, window_bounds = array<i64: 4, 8, 16>}]} {
    %c0 = arith.constant 0 : index
    %c0_0 = arith.constant 0 : index
    %0 = vector.load %arg1[%c0, %c0_0] : memref<64x20xf32, #tpu.memory_space<vmem>>, vector<64x20xf32>
    %c0_1 = arith.constant 0 : index
    %c0_2 = arith.constant 0 : index
    %1 = vector.load %arg2[%c0_1, %c0_2] : memref<20x40xf32, #tpu.memory_space<vmem>>, vector<20x40xf32>
    %cst = arith.constant dense<0.000000e+00> : vector<64x40xf32>
    %2 = tpu.matmul %0, %1, %cst {dimension_numbers = #tpu.dot_dimension_numbers<[1], [0], [0], [1], [0, 0, 1, 1], [], []>} : vector<64x20xf32>, vector<20x40xf32>, vector<64x40xf32> -> vector<64x40xf32>
    %c0_3 = arith.constant 0 : index
    %c0_4 = arith.constant 0 : index
    %3 = vector.load %arg3[%c0_3, %c0_4] : memref<1x40xf32, #tpu.memory_space<vmem>>, vector<1x40xf32>
    %4 = vector.broadcast %3 : vector<1x40xf32> to vector<64x40xf32>
    %5 = arith.addf %2, %4 : vector<64x40xf32>
    %6 = vector.shape_cast %5 : vector<64x40xf32> to vector<4x16x40xf32>
    %7 = vector.extract_strided_slice %6 {offsets = [0, 0, 0], sizes = [4, 8, 20], strides = [1, 1, 1]} : vector<4x16x40xf32> to vector<4x8x20xf32>
    %8 = vector.extract_strided_slice %6 {offsets = [0, 8, 20], sizes = [4, 8, 20], strides = [1, 1, 1]} : vector<4x16x40xf32> to vector<4x8x20xf32>
    %cst_5 = arith.constant dense<0.000000e+00> : vector<4x8x8xf32>
    %9 = tpu.matmul %7, %8, %cst_5 {dimension_numbers = #tpu.dot_dimension_numbers<[2], [2], [1], [1], [0, 0, 0, 1, 1, 1], [0], [0]>} : vector<4x8x20xf32>, vector<4x8x20xf32>, vector<4x8x8xf32> -> vector<4x8x8xf32>
    %cst_6 = arith.constant 0.223606795 : f32
    %10 = vector.broadcast %cst_6 : f32 to vector<4x8x8xf32>
    %11 = arith.mulf %9, %10 : vector<4x8x8xf32>
    %cst_7 = arith.constant dense<0xFF800000> : vector<4x8xf32>
    %12 = vector.multi_reduction <maximumf>, %11, %cst_7 [2] : vector<4x8x8xf32> to vector<4x8xf32>
    %13 = vector.shape_cast %12 : vector<4x8xf32> to vector<4x8x1xf32>
    %14 = vector.broadcast %13 : vector<4x8x1xf32> to vector<4x8x8xf32>
    %15 = arith.subf %11, %14 : vector<4x8x8xf32>
    %16 = math.exp %15 : vector<4x8x8xf32>
    %cst_8 = arith.constant dense<0.000000e+00> : vector<4x8xf32>
    %17 = vector.multi_reduction <add>, %16, %cst_8 [2] : vector<4x8x8xf32> to vector<4x8xf32>
    %18 = vector.shape_cast %17 : vector<4x8xf32> to vector<4x8x1xf32>
    %19 = tpu.reciprocal %18 : vector<4x8x1xf32> -> vector<4x8x1xf32>
    %20 = vector.broadcast %19 : vector<4x8x1xf32> to vector<4x8x8xf32>
    %21 = arith.mulf %16, %20 : vector<4x8x8xf32>
    %c0_9 = arith.constant 0 : index
    %c0_10 = arith.constant 0 : index
    %c0_11 = arith.constant 0 : index
    %22 = vector.load %arg4[%c0_9, %c0_10, %c0_11] : memref<4x8x16xf32, #tpu.memory_space<vmem>>, vector<4x8x16xf32>
    %cst_12 = arith.constant dense<0.000000e+00> : vector<4x8x16xf32>
    %23 = tpu.matmul %21, %22, %cst_12 {dimension_numbers = #tpu.dot_dimension_numbers<[2], [1], [1], [2], [0, 0, 0, 1, 1, 2], [0], [0]>} : vector<4x8x8xf32>, vector<4x8x16xf32>, vector<4x8x16xf32> -> vector<4x8x16xf32>
    %c0_13 = arith.constant 0 : index
    %c0_14 = arith.constant 0 : index
    %c0_15 = arith.constant 0 : index
    %24 = vector.load %arg5[%c0_13, %c0_14, %c0_15] : memref<4x8x16xf32, #tpu.memory_space<vmem>>, vector<4x8x16xf32>
    tpu.vector_store %arg5[%c0_13, %c0_14, %c0_15], %23 {strides = array<i32>} : memref<4x8x16xf32, #tpu.memory_space<vmem>>, vector<4x8x16xf32>,
    return
  }
  func.func @transform_0(%arg0: i32) -> (i32, i32) {
    %c0_i32 = arith.constant 0 : i32
    %c0_i32_0 = arith.constant 0 : i32
    return %arg0, %c0_i32 : i32, i32
  }
  func.func @transform_1(%arg0: i32) -> (i32, i32) {
    %c0_i32 = arith.constant 0 : i32
    %c0_i32_0 = arith.constant 0 : i32
    %c0_i32_1 = arith.constant 0 : i32
    return %c0_i32, %c0_i32_0 : i32, i32
  }
  func.func @transform_2(%arg0: i32) -> (i32, i32) {
    %c0_i32 = arith.constant 0 : i32
    %c0_i32_0 = arith.constant 0 : i32
    %c0_i32_1 = arith.constant 0 : i32
    return %c0_i32, %c0_i32_0 : i32, i32
  }
  func.func @transform_3(%arg0: i32) -> (i32, i32, i32) {
    %c0_i32 = arith.constant 0 : i32
    %c0_i32_0 = arith.constant 0 : i32
    %c0_i32_1 = arith.constant 0 : i32
    return %arg0, %c0_i32, %c0_i32_0 : i32, i32, i32
  }
  func.func @transform_4(%arg0: i32) -> (i32, i32, i32) {
    %c0_i32 = arith.constant 0 : i32
    %c0_i32_0 = arith.constant 0 : i32
    %c0_i32_1 = arith.constant 0 : i32
    return %arg0, %c0_i32, %c0_i32_0 : i32, i32, i32
  }
}

</mosaic_0001>

<bundles_post_ra>
// kernel: tpu_custom_call.1
= control target key start
LH: loop header
LB: loop body
LE: loop exit
PB: predicated region body
PF: predicated region fallthrough
CT: control target
= control target key end

     0   :  { %vm61_vm0 = vcmask 1043456   ;;  %vm36_vm1 = vcmask 162816   ;;  %s1133_s0 = inlined_call_operand.vmem [shape: f32[64,20], index: 0, kind: input, shape index: {}]   ;;  %s1134_s1 = inlined_call_operand.vmem [shape: f32[20,40], index: 1, kind: input, shape index: {}]   ;;  %s1135_s2 = inlined_call_operand.vmem [shape: f32[1,40], index: 2, kind: input, shape index: {}]   ;;  %s1136_s3 = inlined_call_operand.vmem [shape: f32[4,8,16], index: 3, kind: input, shape index: {}]   ;;  %s1137_s4 = inlined_call_operand.hbm [shape: f32[4,8,16], index: 4, kind: output, shape index: {}]  }
   0x1   :  { %v28_v0 = vld [vmem:[%s1134_s1 + $0x10] sm:$0xf]  ;;  %v27_v1 = vld [vmem:[%s1134_s1 + $0x8] sm:$0xff]  ;;  %v18_v2 = vld [vmem:[%s1133_s0] sm:$0xff] }
   0x2   :  { %897 = vmatprep.subr.msk.mxu0 %vm61_vm0, %v28_v0  ;;  %v26_v3 = vld [vmem:[%s1134_s1] sm:$0xff]  ;;  %903 = vmatprep.mubr.msk.f32.mxu0 %vm36_vm1, %v18_v2 }
   0x3   :  { %898 = vmatpush3.msk.msra.mxu0 %vm61_vm0, %v28_v0 }
   0x4   :  { %899 = vmatprep.subr.mxu0 %v27_v1 }
   0x5   :  { %9 = vsyncpa [#allocation3], 0  ;;  %900 = vmatpush3.msra.mxu0 %v27_v1  ;;  %v19_v4 = vld [vmem:[%s1133_s0 + $0x8] sm:$0xff]  ;;  %v20_v5 = vld [vmem:[%s1133_s0 + $0x10] sm:$0xff]  ;;  %v999_v11 = vmov 0.0   ;;  %vm1000_vm2 = vmmov 0  }
   0x6   :  { %901 = vmatprep.subr.mxu0 %v26_v3  ;;  %v21_v6 = vld [vmem:[%s1133_s0 + $0x18] sm:$0xff]  ;;  %v22_v7 = vld [vmem:[%s1133_s0 + $0x20] sm:$0xff]  ;;  %v23_v8 = vld [vmem:[%s1133_s0 + $0x28] sm:$0xff]  ;;  %915 = vmatprep.subr.mxu1 %v999_v11  ;;  %vm486_vm3 = vcmask 64512   ;;  %vm827_vm4 = vcmask 130048  }
   0x7   :  { %902 = vmatpush3.msra.mxu0 %v26_v3  ;;  %v24_v9 = vld [vmem:[%s1133_s0 + $0x30] sm:$0xff]  ;;  %v25_v10 = vld [vmem:[%s1133_s0 + $0x38] sm:$0xff]  ;;  %917 = vmatprep.mubr.msk.f32.mxu1 %vm1000_vm2, %v999_v11  ;;  %v848_v12 = vld [vmem:[%s1135_s2] ss:$0 sm:$0xff]  ;;  %s1001_s0 = smov 108  }
   0x8   :  { %904 = vmatmul.mubr.msk.f32.vlgmr.msra.gmra.mxu0 %vm36_vm1, %v19_v4  ;;  %940 = vmatprep.subr.mxu0 %v999_v11 }
   0x9   :  { %906 = vmatprep.mubr.msk.f32.mxu0 %vm36_vm1, %v20_v5  ;;  %v531_v5 = vld [vmem:[%s1136_s3] sm:$0xff] }
   0xc   :  { %907 = vmatmul.mubr.msk.f32.gmra.mxu0 %vm36_vm1, %v21_v6  ;;  %v532_v6 = vld [vmem:[%s1136_s3 + $0x8] sm:$0xff] }
   0xd   :  { %909 = vmatprep.mubr.msk.f32.mxu0 %vm36_vm1, %v22_v7  ;;  %941 = vmatpush3.msra.mxu0 %v532_v6 }
   0xe   :  { %950 = vmatprep.subr.mxu0 %v999_v11 }
  0x10   :  { %910 = vmatmul.mubr.msk.f32.gmra.mxu0 %vm36_vm1, %v23_v8 }
  0x11   :  { %912 = vmatprep.mubr.msk.f32.mxu0 %vm36_vm1, %v24_v9 }
  0x14   :  { %913 = vmatmul.mubr.msk.f32.gmra.mxu0 %vm36_vm1, %v25_v10 }
  0x15   :  { %942 = vmatprep.mubr.msk.f32.mxu0 %vm1000_vm2, %v999_v11 }
  0xc8   :  { %v905_v13 = vpop.f32.mrf.mxu0 }
  0xc9   :  { %v137_v14 = vadd.f32 %v905_v13, %v848_v12 }
  0xca   :  { %v131_v15 = vpop.f32.mrf.mxu0 }
  0xcb   :  { %v132_v16 = vadd.f32 %v848_v12, %v131_v15  ;;  %171 = vrot.lane.b32.xlu0 %v137_v14, %s1001_s0  ;;  %v533_v14 = vld [vmem:[%s1136_s3 + $0x10] sm:$0xff] }
  0xcc   :  { %v908_v17 = vpop.f32.mrf.mxu0 }
  0xcd   :  { %v147_v18 = vadd.f32 %v908_v17, %v848_v12  ;;  %v534_v17 = vld [vmem:[%s1136_s3 + $0x18] sm:$0xff]  ;;  %s1002_s3 = smov [#allocation2]  }
  0xce   :  { %v141_v19 = vpop.f32.mrf.mxu0  ;;  %s837_s19 = sshll.u32 %s1002_s3, 4  ;;  %s838_s19 = int_to_ptr.vmem [resolvable:$true] %s837_s19 }
  0xcf   :  { %v142_v20 = vadd.f32 %v848_v12, %v141_v19  ;;  %249 = vrot.lane.b32.xlu0 %v147_v18, %s1001_s0  ;;  %s977_s20 = scalar_lea.vmem %s838_s19, 512  ;;  %p982_p1 = scmp.lt.s32.totalorder %s838_s19, %s838_s19 }
  0xd0   :  { %v911_v21 = vpop.f32.mrf.mxu0  ;;  %p978_p0 = scmp.ne.s32.totalorder %s838_s19, %s977_s20  ;;  %p983_p2 = scmp.lt.s32.totalorder %s977_s20, %s977_s20 }
  0xd1   :  { %v157_v22 = vadd.f32 %v911_v21, %v848_v12 }
  0xd2   :  { %v151_v23 = vpop.f32.mrf.mxu0  ;;  %p984_p3 = por %p983_p2, %p982_p1 }
  0xd3   :  { %v152_v24 = vadd.f32 %v848_v12, %v151_v23  ;;  %327 = vrot.lane.b32.xlu1 %v157_v22, %s1001_s0 }
  0xd4   :  { %v914_v25 = vpop.f32.mrf.mxu0  ;;  %p985_p4 = pnand %p984_p3, %p978_p0 }
  0xd5   :  { %v167_v26 = vadd.f32 %v914_v25, %v848_v12 }
  0xd6   :  { %v161_v30 = vpop.f32.mrf.mxu0 }
  0xd7   :  { %405 = vrot.lane.b32.xlu1 %v167_v26, %s1001_s0  ;;  %v162_v32 = vadd.f32 %v848_v12, %v161_v30 }
 0x13d   :  { %v172_v27 = vpop.permute.xlu0 %171 }
 0x13e   :  { %916 = vmatpush3.xpose.msk.msra.mxu1 %vm36_vm1, %v172_v27 }
 0x13f   :  { %920 = vmatprep.subr.mxu1 %v999_v11 }
 0x141   :  { %v250_v28 = vpop.permute.xlu0 %249  ;;  %918 = vmatmul.mubr.msk.f32.vlgmr.msra.gmra.mxu1 %vm36_vm1, %v132_v16 }
 0x142   :  { %921 = vmatpush3.xpose.msk.msra.mxu1 %vm36_vm1, %v250_v28  ;;  %922 = vmatprep.mubr.msk.f32.mxu1 %vm1000_vm2, %v999_v11 }
 0x143   :  { %925 = vmatprep.subr.mxu1 %v999_v11 }
 0x145   :  { %v328_v29 = vpop.permute.xlu1 %327  ;;  %923 = vmatmul.mubr.msk.f32.vlgmr.msra.gmra.mxu1 %vm36_vm1, %v142_v20 }
 0x146   :  { %926 = vmatpush3.xpose.msk.msra.mxu1 %vm36_vm1, %v328_v29  ;;  %927 = vmatprep.mubr.msk.f32.mxu1 %vm1000_vm2, %v999_v11 }
 0x147   :  { %930 = vmatprep.subr.mxu1 %v999_v11 }
 0x149   :  { %v406_v31 = vpop.permute.xlu1 %405  ;;  %928 = vmatmul.mubr.msk.f32.vlgmr.msra.gmra.mxu1 %vm36_vm1, %v152_v24 }
 0x14a   :  { %931 = vmatpush3.xpose.msk.msra.mxu1 %vm36_vm1, %v406_v31  ;;  %932 = vmatprep.mubr.msk.f32.mxu1 %vm1000_vm2, %v999_v11 }
 0x14b   :  { %935 = vmatprep.subr.mxu1 %v999_v11 }
 0x14d   :  { %933 = vmatmul.mubr.msk.f32.vlgmr.msra.gmra.mxu1 %vm36_vm1, %v162_v32 }
 0x14e   :  { %937 = vmatprep.mubr.msk.f32.mxu1 %vm1000_vm2, %v999_v11  ;;  %936 = vmatpush3.msra.mxu1 %v531_v5 }
 0x14f   :  { %945 = vmatprep.subr.mxu1 %v999_v11 }
 0x201   :  { %v244_v33 = vpop.f32.mrf.mxu1 }
 0x202   :  { %v482_v34 = vmul.f32 0.2236068, %v244_v33 }
 0x203   :  { %v919_v35 = vpop.f32.mrf.mxu1 }
 0x204   :  { %v487_v36 = vsel %vm486_vm3, %v482_v34, -inf }
 0x205   :  { %488 = vmax.xlane.f32.xlu0 %v487_v36  ;;  %v322_v37 = vpop.f32.mrf.mxu1 }
 0x206   :  { %v483_v38 = vmul.f32 0.2236068, %v322_v37 }
 0x207   :  { %v924_v39 = vpop.f32.mrf.mxu1 }
 0x208   :  { %v490_v40 = vsel %vm486_vm3, %v483_v38, -inf }
 0x209   :  { %491 = vmax.xlane.f32.xlu1 %v490_v40  ;;  %v400_v41 = vpop.f32.mrf.mxu1 }
 0x20a   :  { %v484_v42 = vmul.f32 0.2236068, %v400_v41 }
 0x20b   :  { %v929_v43 = vpop.f32.mrf.mxu1 }
 0x20c   :  { %v493_v44 = vsel %vm486_vm3, %v484_v42, -inf }
 0x20d   :  { %494 = vmax.xlane.f32.xlu0 %v493_v44  ;;  %v478_v45 = vpop.f32.mrf.mxu1 }
 0x20e   :  { %v485_v46 = vmul.f32 0.2236068, %v478_v45 }
 0x20f   :  { %v934_v47 = vpop.f32.mrf.mxu1 }
 0x210   :  { %v496_v48 = vsel %vm486_vm3, %v485_v46, -inf }
 0x211   :  { %497 = vmax.xlane.f32.xlu0 %v496_v48 }
 0x28e   :  { %v489_v49 = vpop.xlane.xlu0 %488 }
 0x28f   :  { %v499_v50 = vsub.f32 %v482_v34, %v489_v49 }
 0x291   :  { %v503_v51 = vmul.f32 1.442695, %v499_v50 }
 0x292   :  { %v492_v52 = vpop.xlane.xlu1 %491 }
 0x293   :  { %961 = vpow2.f32 %v503_v51  ;;  %v500_v53 = vsub.f32 %v483_v38, %v492_v52 }
 0x295   :  { %v505_v54 = vmul.f32 1.442695, %v500_v53 }
 0x296   :  { %v495_v55 = vpop.xlane.xlu0 %494 }
 0x297   :  { %963 = vpow2.f32 %v505_v54  ;;  %v501_v56 = vsub.f32 %v484_v42, %v495_v55 }
 0x299   :  { %v507_v57 = vmul.f32 1.442695, %v501_v56 }
 0x29a   :  { %v498_v58 = vpop.xlane.xlu0 %497 }
 0x29b   :  { %965 = vpow2.f32 %v507_v57  ;;  %v502_v59 = vsub.f32 %v485_v46, %v498_v58 }
 0x29d   :  { %v509_v60 = vmul.f32 1.442695, %v502_v59 }
 0x29f   :  { %967 = vpow2.f32 %v509_v60 }
 0x2a0   :  { %v962_v61 = vpop.eup %961 }
 0x2a1   :  { %v511_v62 = vsel %vm486_vm3, %v962_v61, 0.0 }
 0x2a2   :  { %512 = vadd.xlane.f32.xlu1 %v511_v62 }
 0x2a4   :  { %v964_v63 = vpop.eup %963 }
 0x2a5   :  { %v514_v0 = vsel %vm486_vm3, %v964_v63, 0.0 }
 0x2a6   :  { %515 = vadd.xlane.f32.xlu0 %v514_v0 }
 0x2a8   :  { %v966_v1 = vpop.eup %965 }
 0x2a9   :  { %v517_v2 = vsel %vm486_vm3, %v966_v1, 0.0 }
 0x2aa   :  { %518 = vadd.xlane.f32.xlu1 %v517_v2 }
 0x2ac   :  { %v968_v3 = vpop.eup %967 }
 0x2ad   :  { %v520_v4 = vsel %vm486_vm3, %v968_v3, 0.0 }
 0x2ae   :  { %521 = vadd.xlane.f32.xlu0 %v520_v4 }
 0x32b   :  { %v513_v7 = vpop.xlane.xlu1 %512 }
 0x32c   :  { %969 = vrcp.f32 %v513_v7 }
 0x32f   :  { %v516_v8 = vpop.xlane.xlu0 %515 }
 0x330   :  { %971 = vrcp.f32 %v516_v8 }
 0x333   :  { %v519_v9 = vpop.xlane.xlu1 %518 }
 0x334   :  { %973 = vrcp.f32 %v519_v9 }
 0x337   :  { %v522_v10 = vpop.xlane.xlu0 %521 }
 0x338   :  { %975 = vrcp.f32 %v522_v10 }
 0x339   :  { %v970_v12 = vpop.eup %969 }
 0x33a   :  { %v527_v13 = vmul.f32 %v970_v12, %v962_v61 }
 0x33c   :  { %938 = vmatmul.mubr.msk.f32.vlgmr.msra.gmra.mxu1 %vm486_vm3, %v527_v13 }
 0x33d   :  { %v972_v15 = vpop.eup %971  ;;  %946 = vmatpush3.msra.mxu1 %v533_v14  ;;  %947 = vmatprep.mubr.msk.f32.mxu1 %vm1000_vm2, %v999_v11 }
 0x33e   :  { %v528_v16 = vmul.f32 %v972_v15, %v964_v63 }
 0x340   :  { %943 = vmatmul.mubr.msk.f32.vlgmr.msra.gmra.mxu0 %vm486_vm3, %v528_v16 }
 0x341   :  { %v974_v18 = vpop.eup %973  ;;  %951 = vmatpush3.msra.mxu0 %v534_v17  ;;  %952 = vmatprep.mubr.msk.f32.mxu0 %vm1000_vm2, %v999_v11 }
 0x342   :  { %v529_v19 = vmul.f32 %v974_v18, %v966_v1 }
 0x344   :  { %948 = vmatmul.mubr.msk.f32.vlgmr.msra.gmra.mxu1 %vm486_vm3, %v529_v19 }
 0x345   :  { %v976_v20 = vpop.eup %975 }
 0x346   :  { %v530_v21 = vmul.f32 %v976_v20, %v968_v3 }
 0x348   :  { %953 = vmatmul.mubr.msk.f32.vlgmr.msra.gmra.mxu0 %vm486_vm3, %v530_v21 }
 0x3fc   :  { %v604_v22 = vpop.f32.mrf.mxu1 }
 0x3fd   :  { %828 = vst.msk [vmem:[#allocation2] sm:$0xff] %vm827_vm4, %v604_v22 }
 0x3fe   :  { %v939_v23 = vpop.f32.mrf.mxu1 }
 0x400   :  { %v677_v24 = vpop.f32.mrf.mxu0 }
 0x401   :  { %829 = vst.msk [vmem:[#allocation2 + $0x8] sm:$0xff] %vm827_vm4, %v677_v24 }
 0x402   :  { %v944_v25 = vpop.f32.mrf.mxu0 }
 0x404   :  { %v750_v26 = vpop.f32.mrf.mxu1 }
 0x405   :  { %830 = vst.msk [vmem:[#allocation2 + $0x10] sm:$0xff] %vm827_vm4, %v750_v26 }
 0x406   :  { %v949_v27 = vpop.f32.mrf.mxu1 }
 0x408   :  { %v823_v11 = vpop.f32.mrf.mxu0 }
 0x409   :  { %831 = vst.msk [vmem:[#allocation2 + $0x18] sm:$0xff] %vm827_vm4, %v823_v11 }
 0x40a   :  { %v954_v28 = vpop.f32.mrf.mxu0 }
 0x40b   :  { %988 = shalt.err (!%p985_p4)
}
 0x40c   :  { %s1003_s21 = smov 128   ;;  %s1004_s22 = smov 8  }
 0x40d   :  { %843 = dma.vmem_to_hbm [thread:$0]  %s838_s19, 512, %s1137_s4, [#allocation3], %s1003_s21, %s1003_s21, %s1004_s22  }
 0x40e   :  { %997 = dma.done.wait [#allocation3], 512  }
 0x40f   :  { %998 = vsyncadd [#allocation3], 4294966784 }
 0x410   :  { %847 = vsyncpa [#allocation3], 1 }

</bundles_post_ra>
